<compile_context>
chip_gen: v6e
topology: v6e:2x2x1
jax: 0.10.0
libtpu: 0.0.40
codegen_flags: <defaults>
</compile_context>

<pallas_src>
import numpy as np
import jax
import jax.numpy as jnp
from jax.experimental import pallas as pl
from jax.experimental.pallas import tpu as pltpu

BETA = 1.0  # SoftDecisionTree.BETA
LANE = 128


def _round_up(x, m):
    return (x + m - 1) // m * m


def sdt_kernel(x_ref, w_ref, b_ref, sel_ref, dist_ref, out_ref):
    # x: (T, F) f32 ; w: (F, c_pad) bf16 ; b: (1, c_pad) f32 ;
    # sel: (c_pad, NL_pad) f32 0/1 ; dist: (NL_pad, K_pad) bf16.
    xb = x_ref[...].astype(jnp.bfloat16)
    z = jnp.dot(xb, w_ref[...], preferred_element_type=jnp.float32) + b_ref[...]
    # Numerically stable log-sigmoid (branch-free): min(z,0) - log(1+exp(-|z|)).
    ls = jnp.minimum(z, 0.0) - jnp.log(1.0 + jnp.exp(-jnp.abs(z)))
    # Sum of per-level log-probabilities for each root->leaf path.  Padded
    # routing columns have all-zero selection rows, so they contribute nothing.
    log_path = jnp.dot(ls, sel_ref[...], preferred_element_type=jnp.float32)
    # Padded leaf columns get log_path == 0 -> path == 1, but their dist rows
    # are zero, so they contribute nothing to the mixture.
    path = jnp.exp(log_path).astype(jnp.bfloat16)
    out_ref[...] = jnp.dot(path, dist_ref[...],
                           preferred_element_type=jnp.float32)


def fold_sdt_params(W, b, leaf_params, depth):
    """Fold routing signs, BETA and the path structure into
    (W_sel, b_sel, selection-matrix, leaf-softmax) with packed, lane-padded
    column layouts."""
    assert depth >= 2, "depth-1 tree is a single leaf; no kernel needed"
    n_levels = depth - 1
    num_leaves = 2 ** (depth - 1)
    in_features = W.shape[1]
    k = leaf_params.shape[1]

    c_real = n_levels * num_leaves
    c_pad = _round_up(c_real, LANE)          # packed routing columns
    nl_pad = _round_up(num_leaves, LANE)     # leaf axis
    k_pad = _round_up(k, LANE)               # class axis

    W_np = np.asarray(W, np.float32)
    b_np = np.asarray(b, np.float32)

    w_sel = np.zeros((in_features, c_pad), np.float32)
    b_sel = np.zeros((1, c_pad), np.float32)
    sel = np.zeros((c_pad, nl_pad), np.float32)
    for j in range(num_leaves):
        pfx = 0
        for lvl in range(n_levels):
            bit = (j >> (depth - 2 - lvl)) & 1      # 1 = go right at this level
            node = 2 ** lvl - 1 + pfx               # heap index of node on path
            sign = 2.0 * bit - 1.0                  # right: +z, left: -z
            col = lvl * num_leaves + j              # packed column
            w_sel[:, col] = BETA * sign * W_np[node, :]
            b_sel[0, col] = BETA * sign * b_np[node]
            sel[col, j] = 1.0
            pfx = pfx * 2 + bit

    # Leaf softmax is batch independent -> precompute on the host.
    lp = np.asarray(leaf_params, np.float32)
    lp = lp - lp.max(axis=-1, keepdims=True)
    e = np.exp(lp)
    dist = e / e.sum(axis=-1, keepdims=True)
    dist_pad = np.zeros((nl_pad, k_pad), np.float32)
    dist_pad[:num_leaves, :k] = dist                # padded rows stay zero

    return (jnp.asarray(w_sel, jnp.bfloat16),
            jnp.asarray(b_sel, jnp.float32),
            jnp.asarray(sel, jnp.float32),
            jnp.asarray(dist_pad, jnp.bfloat16),
            n_levels, c_pad, nl_pad, k_pad)


def sdt_forward(x, W, b, leaf_params, depth, max_tile_bs=1024):
    """x: (bs, F); W: (num_internal, F); b: (num_internal,); leaf_params: (NL, k)."""
    bs, in_features = x.shape
    k = leaf_params.shape[1]
    (w_sel, b_sel, sel, dist, _n_levels,
     c_pad, nl_pad, k_pad) = fold_sdt_params(W, b, leaf_params, depth)

    # --- generation-aware VMEM budget ---------------------------------------
    try:
        vmem_cap = int(getattr(pltpu.get_tpu_info(), "vmem_capacity_bytes",
                               64 << 20))
    except Exception:
        vmem_cap = 64 << 20                  # v7x per-TC (smallest current gen)
    try:
        kind = jax.devices()[0].device_kind.lower()
    except Exception:
        kind = ""
    if "v5 lite" in kind or "v5e" in kind or "v5lite" in kind:
        # v5e: 4x128x128 MXU; 128-256 row tiles already saturate the M dim.
        max_tile_bs = min(max_tile_bs, 256)
    budget = min(max(vmem_cap // 3, 12 << 20), 80 << 20)

    def vmem_bytes(t):
        # Pallas double-buffers EVERY BlockSpec operand, including the
        # grid-invariant ones, so count them twice.
        resident = 2 * (in_features * c_pad * 2      # W_sel (bf16)
                        + c_pad * 4                  # b_sel (f32)
                        + c_pad * nl_pad * 4         # selection matrix (f32)
                        + nl_pad * k_pad * 2)        # dist (bf16)
        streamed = 2 * t * in_features * 4 + 2 * t * k_pad * 4   # x / out tiles
        live = (t * in_features * 2                  # bf16 copy of x tile
                + 2 * t * c_pad * 4                  # z, log-sigmoid
                + 2 * t * nl_pad * 4)                # log_path, path
        return resident + streamed + live

    # --- batch tile choice ----------------------------------------------------
    tile_bs = max(16, min(max_tile_bs, _round_up(bs, 16)))
    if bs < 16:
        tile_bs = _round_up(bs, 8)           # tiny batch: one exact block
    while tile_bs > 16 and vmem_bytes(tile_bs) > budget:
        tile_bs = max(16, _round_up(tile_bs // 2, 16))
    if bs >= 512 and tile_bs >= bs:
        # Give v7x's two TensorCores at least two "parallel" grid blocks.
        tile_bs = max(256, _round_up((bs + 1) // 2, 16))

    grid = (pl.cdiv(bs, tile_bs),)
    vmem_limit = int(min(max(2 * vmem_bytes(tile_bs), 32 << 20),
                         int(vmem_cap * 0.85)))

    out = pl.pallas_call(
        sdt_kernel,
        out_shape=jax.ShapeDtypeStruct((bs, k_pad), jnp.float32),
        grid_spec=pltpu.PrefetchScalarGridSpec(
            num_scalar_prefetch=0,
            grid=grid,
            in_specs=[
                pl.BlockSpec((tile_bs, in_features), lambda i: (i, 0)),  # x tile
                pl.BlockSpec((in_features, c_pad), lambda i: (0, 0)),    # W_sel
                pl.BlockSpec((1, c_pad), lambda i: (0, 0)),              # b_sel
                pl.BlockSpec((c_pad, nl_pad), lambda i: (0, 0)),         # sel
                pl.BlockSpec((nl_pad, k_pad), lambda i: (0, 0)),         # dist
            ],
            out_specs=pl.BlockSpec((tile_bs, k_pad), lambda i: (i, 0)),
        ),
        compiler_params=pltpu.CompilerParams(
            dimension_semantics=("parallel",),   # megacore split on v7x
            vmem_limit_bytes=vmem_limit,
        ),
    )(x.astype(jnp.float32), w_sel, b_sel, sel, dist)
    return out[:, :k]


def sdt_matched_ref(x, w_sel, b_sel, sel, dist):
    """Pure-JAX model of the exact folded / bf16 / log-space math the kernel does."""
    z = jnp.dot(x.astype(jnp.bfloat16), w_sel,
                preferred_element_type=jnp.float32) + b_sel
    ls = jnp.minimum(z, 0.0) - jnp.log(1.0 + jnp.exp(-jnp.abs(z)))
    log_path = jnp.dot(ls, sel, preferred_element_type=jnp.float32)
    path = jnp.exp(log_path).astype(jnp.bfloat16)
    return jnp.dot(path, dist, preferred_element_type=jnp.float32)


def sdt_reference(x, W, b, leaf_params, depth):
    """Pure-JAX f32 recursive reference mirroring the PyTorch Branch/Leaf code."""
    bs = x.shape[0]
    k = leaf_params.shape[1]

    def rec(node_idx, leaf_base, d):
        if d == 1:
            dist = jax.nn.softmax(leaf_params[leaf_base])
            return jnp.broadcast_to(dist[None, :], (bs, k))
        z = x @ W[node_idx] + b[node_idx]             # (bs,)
        ps = jax.nn.sigmoid(BETA * z)[:, None]        # (bs, 1)
        l_dists = rec(2 * node_idx + 1, leaf_base, d - 1)
        r_dists = rec(2 * node_idx + 2, leaf_base + 2 ** (d - 2), d - 1)
        return (1.0 - ps) * l_dists + ps * r_dists

    return rec(0, 0, depth)


if __name__ == "__main__":
    # Small, deterministic configuration.
    bs = 8
    in_features = 64
    k = 10
    depth = 4                       # -> 7 internal nodes, 8 leaves
    num_internal = 2 ** (depth - 1) - 1
    num_leaves = 2 ** (depth - 1)

    key = jax.random.PRNGKey(0)
    kx, kw, kb, kl = jax.random.split(key, 4)
    x = jax.random.normal(kx, (bs, in_features), jnp.float32)
    W = jax.random.normal(kw, (num_internal, in_features), jnp.float32) * 0.1
    b = jax.random.normal(kb, (num_internal,), jnp.float32) * 0.1
    leaf_params = jax.random.normal(kl, (num_leaves, k), jnp.float32)

    out = jax.block_until_ready(sdt_forward(x, W, b, leaf_params, depth))
    assert out.shape == (bs, k)

    # Tight check against a pure-JAX model of the identical folded/bf16 math.
    w_sel, b_sel, sel, dist, n_levels, c_pad, nl_pad, k_pad = fold_sdt_params(
        W, b, leaf_params, depth)
    matched = jax.block_until_ready(
        sdt_matched_ref(x, w_sel, b_sel, sel, dist))[:, :k]
    assert np.allclose(np.asarray(out), np.asarray(matched),
                       rtol=5e-3, atol=5e-3), "kernel != matched bf16 reference"

    # Looser check against the f32 recursive reference (bf16 rounding).
    ref = jax.block_until_ready(sdt_reference(x, W, b, leaf_params, depth))
    assert np.allclose(np.asarray(out), np.asarray(ref),
                       rtol=2e-2, atol=2e-2), (
        "Pallas SDT output does not match reference")
    # Each row should (approximately, up to bf16 rounding) be a distribution.
    assert np.allclose(np.asarray(out).sum(-1), 1.0, atol=1e-2)

    print("KERNEL_OK")
</pallas_src>

<mosaic_0001>
module attributes {stable_mosaic.version = 11 : i64} {
  func.func @sdt_kernel(%arg0: i32, %arg1: memref<8x64xf32, #tpu.memory_space<vmem>>, %arg2: memref<64x128xbf16, #tpu.memory_space<vmem>>, %arg3: memref<1x128xf32, #tpu.memory_space<vmem>>, %arg4: memref<128x128xf32, #tpu.memory_space<vmem>>, %arg5: memref<128x128xbf16, #tpu.memory_space<vmem>>, %arg6: memref<8x128xf32, #tpu.memory_space<vmem>>) attributes {dimension_semantics = [#tpu.dimension_semantics<parallel>], iteration_bounds = array<i64: 1>, scalar_prefetch = 0 : i64, scratch_operands = 0 : i64, tpu.core_type = #tpu.core_type<tc>, window_params = [{transform_indices = @transform_0, window_bounds = array<i64: 8, 64>}, {pipeline_mode = #tpu.pipeline_mode<synchronous>, transform_indices = @transform_1, window_bounds = array<i64: 64, 128>}, {pipeline_mode = #tpu.pipeline_mode<synchronous>, transform_indices = @transform_2, window_bounds = array<i64: 1, 128>}, {pipeline_mode = #tpu.pipeline_mode<synchronous>, transform_indices = @transform_3, window_bounds = array<i64: 128, 128>}, {pipeline_mode = #tpu.pipeline_mode<synchronous>, transform_indices = @transform_4, window_bounds = array<i64: 128, 128>}, {transform_indices = @transform_5, window_bounds = array<i64: 8, 128>}]} {
    %c0 = arith.constant 0 : index
    %c0_0 = arith.constant 0 : index
    %0 = vector.load %arg1[%c0, %c0_0] : memref<8x64xf32, #tpu.memory_space<vmem>>, vector<8x64xf32>
    %1 = arith.truncf %0 : vector<8x64xf32> to vector<8x64xbf16>
    %c0_1 = arith.constant 0 : index
    %c0_2 = arith.constant 0 : index
    %2 = vector.load %arg2[%c0_1, %c0_2] : memref<64x128xbf16, #tpu.memory_space<vmem>>, vector<64x128xbf16>
    %cst = arith.constant dense<0.000000e+00> : vector<8x128xf32>
    %3 = tpu.matmul %1, %2, %cst {dimension_numbers = #tpu.dot_dimension_numbers<[1], [0], [0], [1], [0, 0, 1, 1], [], []>} : vector<8x64xbf16>, vector<64x128xbf16>, vector<8x128xf32> -> vector<8x128xf32>
    %c0_3 = arith.constant 0 : index
    %c0_4 = arith.constant 0 : index
    %4 = vector.load %arg3[%c0_3, %c0_4] : memref<1x128xf32, #tpu.memory_space<vmem>>, vector<1x128xf32>
    %5 = vector.broadcast %4 : vector<1x128xf32> to vector<8x128xf32>
    %6 = arith.addf %3, %5 : vector<8x128xf32>
    %cst_5 = arith.constant 0.000000e+00 : f32
    %7 = vector.broadcast %cst_5 : f32 to vector<8x128xf32>
    %8 = arith.minimumf %6, %7 : vector<8x128xf32>
    %9 = math.absf %6 : vector<8x128xf32>
    %cst_6 = arith.constant 0.000000e+00 : f32
    %10 = vector.broadcast %cst_6 : f32 to vector<8x128xf32>
    %11 = arith.subf %10, %9 : vector<8x128xf32>
    %12 = math.exp %11 : vector<8x128xf32>
    %cst_7 = arith.constant 1.000000e+00 : f32
    %13 = vector.broadcast %cst_7 : f32 to vector<8x128xf32>
    %14 = arith.addf %13, %12 : vector<8x128xf32>
    %15 = math.log %14 : vector<8x128xf32>
    %16 = arith.subf %8, %15 : vector<8x128xf32>
    %c0_8 = arith.constant 0 : index
    %c0_9 = arith.constant 0 : index
    %17 = vector.load %arg4[%c0_8, %c0_9] : memref<128x128xf32, #tpu.memory_space<vmem>>, vector<128x128xf32>
    %cst_10 = arith.constant dense<0.000000e+00> : vector<8x128xf32>
    %18 = tpu.matmul %16, %17, %cst_10 {dimension_numbers = #tpu.dot_dimension_numbers<[1], [0], [0], [1], [0, 0, 1, 1], [], []>} : vector<8x128xf32>, vector<128x128xf32>, vector<8x128xf32> -> vector<8x128xf32>
    %19 = math.exp %18 : vector<8x128xf32>
    %20 = arith.truncf %19 : vector<8x128xf32> to vector<8x128xbf16>
    %c0_11 = arith.constant 0 : index
    %c0_12 = arith.constant 0 : index
    %21 = vector.load %arg5[%c0_11, %c0_12] : memref<128x128xbf16, #tpu.memory_space<vmem>>, vector<128x128xbf16>
    %cst_13 = arith.constant dense<0.000000e+00> : vector<8x128xf32>
    %22 = tpu.matmul %20, %21, %cst_13 {dimension_numbers = #tpu.dot_dimension_numbers<[1], [0], [0], [1], [0, 0, 1, 1], [], []>} : vector<8x128xbf16>, vector<128x128xbf16>, vector<8x128xf32> -> vector<8x128xf32>
    %c0_14 = arith.constant 0 : index
    %c0_15 = arith.constant 0 : index
    %23 = vector.load %arg6[%c0_14, %c0_15] : memref<8x128xf32, #tpu.memory_space<vmem>>, vector<8x128xf32>
    tpu.vector_store %arg6[%c0_14, %c0_15], %22 {strides = array<i32>} : memref<8x128xf32, #tpu.memory_space<vmem>>, vector<8x128xf32>,
    return
  }
  func.func @transform_0(%arg0: i32) -> (i32, i32) {
    %c0_i32 = arith.constant 0 : i32
    %c0_i32_0 = arith.constant 0 : i32
    return %arg0, %c0_i32 : i32, i32
  }
  func.func @transform_1(%arg0: i32) -> (i32, i32) {
    %c0_i32 = arith.constant 0 : i32
    %c0_i32_0 = arith.constant 0 : i32
    %c0_i32_1 = arith.constant 0 : i32
    return %c0_i32, %c0_i32_0 : i32, i32
  }
  func.func @transform_2(%arg0: i32) -> (i32, i32) {
    %c0_i32 = arith.constant 0 : i32
    %c0_i32_0 = arith.constant 0 : i32
    %c0_i32_1 = arith.constant 0 : i32
    return %c0_i32, %c0_i32_0 : i32, i32
  }
  func.func @transform_3(%arg0: i32) -> (i32, i32) {
    %c0_i32 = arith.constant 0 : i32
    %c0_i32_0 = arith.constant 0 : i32
    %c0_i32_1 = arith.constant 0 : i32
    return %c0_i32, %c0_i32_0 : i32, i32
  }
  func.func @transform_4(%arg0: i32) -> (i32, i32) {
    %c0_i32 = arith.constant 0 : i32
    %c0_i32_0 = arith.constant 0 : i32
    %c0_i32_1 = arith.constant 0 : i32
    return %c0_i32, %c0_i32_0 : i32, i32
  }
  func.func @transform_5(%arg0: i32) -> (i32, i32) {
    %c0_i32 = arith.constant 0 : i32
    %c0_i32_0 = arith.constant 0 : i32
    return %arg0, %c0_i32 : i32, i32
  }
}

</mosaic_0001>

<bundles_post_ra>
// kernel: tpu_custom_call.1
= control target key start
LH: loop header
LB: loop body
LE: loop exit
PB: predicated region body
PF: predicated region fallthrough
CT: control target
= control target key end

     0   :  { %10 = vsyncpa [#allocation3], 0  ;;  %s728_s0 = inlined_call_operand.hbm [shape: f32[8,64], index: 0, kind: input, shape index: {}]   ;;  %s729_s1 = inlined_call_operand.hbm [shape: bf16[64,128], index: 1, kind: input, shape index: {}]   ;;  %s730_s2 = inlined_call_operand.vmem [shape: f32[1,128], index: 2, kind: input, shape index: {}]   ;;  %s731_s3 = inlined_call_operand.hbm [shape: f32[128,128], index: 3, kind: input, shape index: {}]   ;;  %s732_s4 = inlined_call_operand.hbm [shape: bf16[128,128], index: 4, kind: input, shape index: {}]   ;;  %s733_s5 = inlined_call_operand.hbm [shape: f32[8,128], index: 5, kind: output, shape index: {}]  }
   0x1   :  { %11 = vsyncpa [#allocation6], 0 }
   0x2   :  { %12 = vsyncpa [#allocation9], 0 }
   0x3   :  { %13 = vsyncpa [#allocation4], 0  ;;  %s629_s18 = smov [#allocation5]  }
   0x4   :  { %s29_s19 = sshll.u32 %s629_s18, 4  ;;  %s30_s19 = int_to_ptr.vmem [resolvable:$true] %s29_s19 }
   0x5   :  { %s529_s20 = scalar_lea.vmem %s30_s19, 512  ;;  %p534_p1 = scmp.lt.s32.totalorder %s30_s19, %s30_s19 }
   0x6   :  { %p530_p0 = scmp.ne.s32.totalorder %s30_s19, %s529_s20  ;;  %p535_p2 = scmp.lt.s32.totalorder %s529_s20, %s529_s20 }
   0x8   :  { %p536_p3 = por %p535_p2, %p534_p1 }
   0xa   :  { %p537_p4 = pnand %p536_p3, %p530_p0 }
   0xc   :  { %540 = shalt.err (!%p537_p4)
}
   0xd   :  { %s630_s21 = smov 64   ;;  %s631_s22 = smov 4  }
   0xe   :  { %35 = dma.hbm_to_vmem [thread:$0]  %s729_s1, 512, %s30_s19, [#allocation6], %s630_s21, %s630_s21, %s631_s22  }
   0xf   :  { %s632_s25 = smov [#allocation2]   ;;  %s633_s27 = smov [#allocation7]  }
  0x10   :  { %s20_s26 = sshll.u32 %s632_s25, 4  ;;  %s43_s28 = sshll.u32 %s633_s27, 4  ;;  %s21_s26 = int_to_ptr.vmem [resolvable:$true] %s20_s26  ;;  %s44_s28 = int_to_ptr.vmem [resolvable:$true] %s43_s28 }
  0x11   :  { %s549_s29 = scalar_lea.vmem %s21_s26, 128  ;;  %p554_p6 = scmp.lt.s32.totalorder %s21_s26, %s21_s26 }
  0x12   :  { %p550_p5 = scmp.ne.s32.totalorder %s21_s26, %s549_s29  ;;  %p555_p7 = scmp.lt.s32.totalorder %s549_s29, %s549_s29 }
  0x14   :  { %p556_p8 = por %p555_p7, %p554_p6 }
  0x16   :  { %p557_p9 = pnand %p556_p8, %p550_p5 }
  0x18   :  { %560 = shalt.err (!%p557_p9)
}
  0x19   :  { %23 = dma.hbm_to_vmem [thread:$0]  %s728_s0, 128, %s21_s26, [#allocation3]  }
  0x1a   :  { %s569_s7 = scalar_lea.vmem %s44_s28, 2048  ;;  %p574_p11 = scmp.lt.s32.totalorder %s44_s28, %s44_s28 }
  0x1b   :  { %p570_p10 = scmp.ne.s32.totalorder %s44_s28, %s569_s7  ;;  %p575_p12 = scmp.lt.s32.totalorder %s569_s7, %s569_s7 }
  0x1d   :  { %p576_p13 = por %p575_p12, %p574_p11 }
  0x1f   :  { %p577_p0 = pnand %p576_p13, %p570_p10 }
  0x21   :  { %580 = shalt.err (!%p577_p0)
}
  0x22   :  { %s634_s1 = smov 128   ;;  %s635_s8 = smov 8  }
  0x23   :  { %49 = dma.hbm_to_vmem [thread:$0]  %s731_s3, 2048, %s44_s28, [#allocation6], %s634_s1, %s634_s1, %s635_s8  }
  0x24   :  { %s636_s11 = smov [#allocation8]  }
  0x25   :  { %s55_s12 = sshll.u32 %s636_s11, 4  ;;  %s56_s12 = int_to_ptr.vmem [resolvable:$true] %s55_s12 }
  0x26   :  { %s589_s13 = scalar_lea.vmem %s56_s12, 1024  ;;  %p594_p2 = scmp.lt.s32.totalorder %s56_s12, %s56_s12 }
  0x27   :  { %p590_p1 = scmp.ne.s32.totalorder %s56_s12, %s589_s13  ;;  %p595_p3 = scmp.lt.s32.totalorder %s589_s13, %s589_s13 }
  0x29   :  { %p596_p4 = por %p595_p3, %p594_p2 }
  0x2b   :  { %p597_p5 = pnand %p596_p4, %p590_p1 }
  0x2d   :  { %600 = shalt.err (!%p597_p5)
}
  0x2e   :  { %61 = dma.hbm_to_vmem [thread:$0]  %s732_s4, 1024, %s56_s12, [#allocation9], %s630_s21, %s630_s21, %s631_s22  }
  0x2f   :  { %621 = dma.done.wait [#allocation3], 128  }
  0x30   :  { %622 = vsyncadd [#allocation3], 4294967168 }
  0x31   :  { %623 = dma.done.wait [#allocation6], 2560  }
  0x32   :  { %624 = vsyncadd [#allocation6], 4294964736 }
  0x33   :  { %625 = dma.done.wait [#allocation9], 1024  }
  0x34   :  { %626 = vsyncadd [#allocation9], 4294966272  ;;  %v637_v0 = vmov 0.0   ;;  %vm638_vm0 = vmmov 0   ;;  %v503_v1 = vld [vmem:[#allocation5 + $0x18] sm:$0xff]   ;;  %v504_v2 = vld [vmem:[#allocation5 + $0x10] sm:$0xff]  }
  0x35   :  { %425 = vmatprep.subr.bf16.mxu1 %v637_v0  ;;  %433 = vmatprep.mubr.msk.bf16.mxu1 %vm638_vm0, %v637_v0  ;;  %v505_v3 = vld [vmem:[#allocation5 + $0x8] sm:$0xff]   ;;  %v506_v4 = vld [vmem:[#allocation5] sm:$0xff]   ;;  %v75_v5 = vld [vmem:[#allocation2] sm:$0xff]  ;;  %vm116_vm1 = vcmask 523264  }
  0x36   :  { %472 = vmatprep.subr.bf16.mxu0 %v637_v0  ;;  %488 = vmatprep.mubr.msk.bf16.mxu0 %vm638_vm0, %v637_v0  ;;  %v76_v6 = vpack.c.bf16 %v75_v5, %v75_v5  ;;  %v184_v7 = vld [vmem:[#allocation7 + $0x78] sm:$0xff]  ;;  %v183_v8 = vld [vmem:[#allocation7 + $0x70] sm:$0xff]  ;;  %v182_v9 = vld [vmem:[#allocation7 + $0x68] sm:$0xff] }
  0x37   :  { %426 = vmatpush3.bf16.msra.mxu1 %v503_v1  ;;  %v181_v10 = vld [vmem:[#allocation7 + $0x60] sm:$0xff]  ;;  %v180_v11 = vld [vmem:[#allocation7 + $0x58] sm:$0xff]  ;;  %v179_v12 = vld [vmem:[#allocation7 + $0x50] sm:$0xff] }
  0x38   :  { %427 = vmatprep.subr.bf16.mxu1 %v637_v0  ;;  %v178_v13 = vld [vmem:[#allocation7 + $0x48] sm:$0xff]  ;;  %v177_v14 = vld [vmem:[#allocation7 + $0x40] sm:$0xff]  ;;  %v176_v15 = vld [vmem:[#allocation7 + $0x38] sm:$0xff] }
  0x39   :  { %v175_v16 = vld [vmem:[#allocation7 + $0x30] sm:$0xff]  ;;  %v174_v17 = vld [vmem:[#allocation7 + $0x28] sm:$0xff]  ;;  %v173_v18 = vld [vmem:[#allocation7 + $0x20] sm:$0xff] }
  0x3a   :  { %v172_v19 = vld [vmem:[#allocation7 + $0x18] sm:$0xff]  ;;  %v171_v20 = vld [vmem:[#allocation7 + $0x10] sm:$0xff]  ;;  %v170_v21 = vld [vmem:[#allocation7 + $0x8] sm:$0xff] }
  0x3b   :  { %428 = vmatpush3.bf16.msra.mxu1 %v504_v2  ;;  %v169_v22 = vld [vmem:[#allocation7] sm:$0xff]  ;;  %v507_v23 = vld [vmem:[#allocation8 + $0x38] sm:$0xff]   ;;  %v508_v24 = vld [vmem:[#allocation8 + $0x30] sm:$0xff]  }
  0x3c   :  { %429 = vmatprep.subr.bf16.mxu1 %v637_v0  ;;  %473 = vmatpush3.bf16.msra.mxu0 %v507_v23  ;;  %v509_v25 = vld [vmem:[#allocation8 + $0x28] sm:$0xff]   ;;  %v380_v26 = vld [vmem:[%s730_s2] ss:$0 sm:$0xff]  ;;  %v510_v41 = vld [vmem:[#allocation8 + $0x20] sm:$0xff]   ;;  %s639_s2 = smov [#allocation10]  }
  0x3d   :  { %474 = vmatprep.subr.bf16.mxu0 %v637_v0  ;;  %v511_v42 = vld [vmem:[#allocation8 + $0x18] sm:$0xff]   ;;  %v512_v43 = vld [vmem:[#allocation8 + $0x10] sm:$0xff]   ;;  %v513_v44 = vld [vmem:[#allocation8 + $0x8] sm:$0xff]   ;;  %s369_s15 = sshll.u32 %s639_s2, 4  ;;  %s370_s15 = int_to_ptr.vmem [resolvable:$true] %s369_s15 }
  0x3e   :  { %v514_v45 = vld [vmem:[#allocation8] sm:$0xff]   ;;  %s601_s16 = scalar_lea.vmem %s370_s15, 128  ;;  %p606_p7 = scmp.lt.s32.totalorder %s370_s15, %s370_s15 }
  0x3f   :  { %430 = vmatpush3.bf16.msra.mxu1 %v505_v3  ;;  %p602_p6 = scmp.ne.s32.totalorder %s370_s15, %s601_s16  ;;  %p607_p8 = scmp.lt.s32.totalorder %s601_s16, %s601_s16 }
  0x40   :  { %431 = vmatprep.subr.bf16.mxu1 %v637_v0  ;;  %475 = vmatpush3.bf16.msra.mxu0 %v508_v24 }
  0x41   :  { %476 = vmatprep.subr.bf16.mxu0 %v637_v0  ;;  %p608_p9 = por %p607_p8, %p606_p7 }
  0x43   :  { %432 = vmatpush3.bf16.msra.mxu1 %v506_v4  ;;  %p609_p10 = pnand %p608_p9, %p602_p6 }
  0x44   :  { %437 = vmatprep.subr.mxu1 %v637_v0  ;;  %477 = vmatpush3.bf16.msra.mxu0 %v509_v25 }
  0x45   :  { %478 = vmatprep.subr.bf16.mxu0 %v637_v0 }
  0x46   :  { %434 = vmatmul.mubr.msk.bf16.vlgmr.msra.gmra.mxu1 %vm116_vm1, %v76_v6 }
  0x47   :  { %469 = vmatprep.mubr.msk.f32.mxu1 %vm638_vm0, %v637_v0  ;;  %438 = vmatpush3.msra.mxu1 %v184_v7 }
  0x48   :  { %439 = vmatprep.subr.mxu1 %v637_v0  ;;  %479 = vmatpush3.bf16.msra.mxu0 %v510_v41 }
  0x49   :  { %440 = vmatpush3.msra.mxu1 %v183_v8  ;;  %480 = vmatprep.subr.bf16.mxu0 %v637_v0 }
  0x4a   :  { %441 = vmatprep.subr.mxu1 %v637_v0 }
  0x4b   :  { %442 = vmatpush3.msra.mxu1 %v182_v9 }
  0x4c   :  { %443 = vmatprep.subr.mxu1 %v637_v0  ;;  %481 = vmatpush3.bf16.msra.mxu0 %v511_v42 }
  0x4d   :  { %444 = vmatpush3.msra.mxu1 %v181_v10  ;;  %482 = vmatprep.subr.bf16.mxu0 %v637_v0 }
  0x4e   :  { %445 = vmatprep.subr.mxu1 %v637_v0 }
  0x4f   :  { %446 = vmatpush3.msra.mxu1 %v180_v11 }
  0x50   :  { %447 = vmatprep.subr.mxu1 %v637_v0  ;;  %483 = vmatpush3.bf16.msra.mxu0 %v512_v43 }
  0x51   :  { %448 = vmatpush3.msra.mxu1 %v179_v12  ;;  %484 = vmatprep.subr.bf16.mxu0 %v637_v0 }
  0x52   :  { %449 = vmatprep.subr.mxu1 %v637_v0 }
  0x53   :  { %450 = vmatpush3.msra.mxu1 %v178_v13 }
  0x54   :  { %451 = vmatprep.subr.mxu1 %v637_v0  ;;  %485 = vmatpush3.bf16.msra.mxu0 %v513_v44 }
  0x55   :  { %452 = vmatpush3.msra.mxu1 %v177_v14  ;;  %486 = vmatprep.subr.bf16.mxu0 %v637_v0 }
  0x56   :  { %453 = vmatprep.subr.mxu1 %v637_v0 }
  0x57   :  { %454 = vmatpush3.msra.mxu1 %v176_v15 }
  0x58   :  { %455 = vmatprep.subr.mxu1 %v637_v0  ;;  %487 = vmatpush3.bf16.msra.mxu0 %v514_v45 }
  0x59   :  { %456 = vmatpush3.msra.mxu1 %v175_v16 }
  0x5a   :  { %457 = vmatprep.subr.mxu1 %v637_v0 }
  0x5b   :  { %458 = vmatpush3.msra.mxu1 %v174_v17 }
  0x5c   :  { %459 = vmatprep.subr.mxu1 %v637_v0 }
  0x5d   :  { %460 = vmatpush3.msra.mxu1 %v173_v18 }
  0x5e   :  { %461 = vmatprep.subr.mxu1 %v637_v0 }
  0x5f   :  { %462 = vmatpush3.msra.mxu1 %v172_v19 }
  0x60   :  { %463 = vmatprep.subr.mxu1 %v637_v0 }
  0x61   :  { %464 = vmatpush3.msra.mxu1 %v171_v20 }
  0x62   :  { %465 = vmatprep.subr.mxu1 %v637_v0 }
  0x63   :  { %466 = vmatpush3.msra.mxu1 %v170_v21 }
  0x64   :  { %467 = vmatprep.subr.mxu1 %v637_v0 }
  0x65   :  { %468 = vmatpush3.msra.mxu1 %v169_v22 }
 0x106   :  { %v154_v27 = vpop.f32.mrf.mxu1 }
 0x107   :  { %v155_v28 = vadd.f32 %v380_v26, %v154_v27 }
 0x108   :  { %v435_v29 = vpop.f32.mrf.mxu1 }
 0x109   :  { %v161_v30 = vand.u32 2147483647, %v155_v28  ;;  %v160_v38 = vmin.f32 %v155_v28, 0.0 }
 0x10a   :  { %v157_v31 = vpop.f32.mrf.mxu1 }
 0x10b   :  { %v162_v32 = vsub.f32 0.0, %v161_v30 }
 0x10c   :  { %v436_v33 = vpop.f32.mrf.mxu1 }
 0x10d   :  { %v163_v34 = vmul.f32 1.442695, %v162_v32 }
 0x10f   :  { %515 = vpow2.f32 %v163_v34 }
 0x11c   :  { %v516_v35 = vpop.eup %515 }
 0x11d   :  { %v165_v36 = vadd.f32 1.0, %v516_v35 }
 0x11f   :  { %517 = vlog2.f32 %v165_v36 }
 0x12c   :  { %v518_v37 = vpop.eup %517 }
 0x12d   :  { %v167_v39 = vmul.f32 0.6931472, %v518_v37 }
 0x12f   :  { %v168_v40 = vsub.f32 %v160_v38, %v167_v39 }
 0x131   :  { %470 = vmatmul.mubr.f32.vlgmr.msra.gmra.mxu1 %v168_v40 }
 0x1f1   :  { %v251_v46 = vpop.f32.mrf.mxu1 }
 0x1f2   :  { %v255_v47 = vmul.f32 1.442695, %v251_v46 }
 0x1f3   :  { %v471_v48 = vpop.f32.mrf.mxu1 }
 0x1f4   :  { %519 = vpow2.f32 %v255_v47 }
 0x201   :  { %v520_v49 = vpop.eup %519 }
 0x202   :  { %v257_v50 = vpack.c.bf16 %v520_v49, %v520_v49 }
 0x204   :  { %489 = vmatmul.mubr.bf16.vlgmr.msra.gmra.mxu0 %v257_v50 }
 0x2c4   :  { %v356_v51 = vpop.f32.mrf.mxu0 }
 0x2c5   :  { %362 = vst [vmem:[#allocation10] sm:$0xff] %v356_v51 }
 0x2c6   :  { %v490_v52 = vpop.f32.mrf.mxu0 }
 0x2c7   :  { %612 = shalt.err (!%p609_p10)
}
 0x2c8   :  { %372 = dma.vmem_to_hbm [thread:$0]  %s370_s15, 128, %s733_s5, [#allocation4]   ;;  %v359_v53 = vpop.f32.mrf.mxu0 }
 0x2ca   :  { %v491_v54 = vpop.f32.mrf.mxu0 }
 0x2cb   :  { %627 = dma.done.wait [#allocation4], 128  }
 0x2cc   :  { %628 = vsyncadd [#allocation4], 4294967168 }
 0x2cd   :  { %376 = vsyncpa [#allocation3], 1 }
 0x2ce   :  { %377 = vsyncpa [#allocation6], 1 }
 0x2cf   :  { %378 = vsyncpa [#allocation9], 1 }
 0x2d0   :  { %379 = vsyncpa [#allocation4], 1 }

</bundles_post_ra>
